<compile_context>
chip_gen: v6e
topology: v6e:2x2x1
jax: 0.10.0
libtpu: 0.0.40
codegen_flags: <defaults>
</compile_context>

<pallas_src>
import numpy as np
import jax
import jax.numpy as jnp
from jax.experimental import pallas as pl
from jax.experimental.pallas import tpu as pltpu


def _round_up(x, m):
    return ((x + m - 1) // m) * m


# ---------------------------------------------------------------------------
# Kernels
# ---------------------------------------------------------------------------
def _paste_post_kernel(img_ref, msk_ref, post_ref):
    img = img_ref[...]
    m = msk_ref[...]                          # (1, 1, R, 128) broadcasts over C
    masked = img * (1.0 - m) + m              # images * (1 - masks) + masks
    post_ref[...] = (masked * 255.0).astype(post_ref.dtype)


def _paste_post_masked_kernel(img_ref, msk_ref, post_ref, masked_ref):
    img = img_ref[...]
    m = msk_ref[...]
    masked = img * (1.0 - m) + m
    post_ref[...] = (masked * 255.0).astype(post_ref.dtype)
    masked_ref[...] = masked


# ---------------------------------------------------------------------------
# Tile / VMEM planning
# ---------------------------------------------------------------------------
def _vmem_budget():
    try:
        vmem_cap = int(pltpu.get_tpu_info().vmem_capacity_bytes)
    except Exception:
        vmem_cap = 64 * 1024 * 1024           # conservative default: v7x per-TC
    budget = min(28 * 1024 * 1024, vmem_cap // 2)
    # ~256K px blocks on 128 MiB-class chips (v5e/v6e), ~128K px on v7x.
    max_px = 256 * 1024 if vmem_cap >= 96 * 1024 * 1024 else 128 * 1024
    return vmem_cap, budget, max_px


def _block_footprint_rows(r, C, emit_masked):
    # Exact double-buffered VMEM bytes for blocks of (r, 128) spatial shape,
    # including Mosaic sublane padding (8 for f32, 32 for uint8).
    r8 = _round_up(r, 8)
    r32 = _round_up(r, 32)
    per = C * r8 * 128 * 4                    # f32 image block
    per += r8 * 128 * 4                       # f32 mask block
    per += C * r32 * 128                      # uint8 postprocess block
    if emit_masked:
        per += C * r8 * 128 * 4               # f32 images_masked block
    return 2 * per                            # double-buffered pipeline


def _select_rows(rows_total, C, emit_masked, budget, max_px, n_batch):
    # Legal R: multiple of 32 dividing rows_total, or rows_total itself
    # (block == full dim), so every stream stays sublane-dense.
    cands = [r for r in range(32, rows_total + 1, 32) if rows_total % r == 0]
    cands.append(rows_total)
    cands = sorted(set(cands))
    max_rows = max(1, max_px // 128)
    fitting = [r for r in cands
               if _block_footprint_rows(r, C, emit_masked) <= budget
               and r <= max_rows]
    if not fitting:
        fitting = [cands[0]]
    # v7x megacore: prefer a grid with >= 2 total blocks so both TCs get work.
    occupied = [r for r in fitting if n_batch * (rows_total // r) >= 2]
    pool = occupied if occupied else fitting
    r = max(pool)
    return r, _block_footprint_rows(r, C, emit_masked)


# ---------------------------------------------------------------------------
# Forward wrapper
# ---------------------------------------------------------------------------
def paste_model_forward(images, masks, *, return_masked=False):
    """PasteModel.forward masking composite + postprocess scaling/cast.

    images: (N, C, H, W) float32 in [0, 1]; masks: (N, 1, H, W) float32 in {0, 1}.
    Returns the postprocess image as uint8 NCHW (host-side NHWC permute via
    postprocess_nhwc_host). With return_masked=True also returns images_masked
    (float32 NCHW), the tensor the generator would consume.
    """
    N, C, H, W = images.shape
    assert masks.shape == (N, 1, H, W)
    P = H * W

    vmem_cap, budget, max_px = _vmem_budget()

    flops = 3 * N * C * P + N * P
    bytes_accessed = N * C * P * 4 + N * P * 4 + N * C * P
    if return_masked:
        bytes_accessed += N * C * P * 4
    cost = pl.CostEstimate(flops=flops, transcendentals=0,
                           bytes_accessed=bytes_accessed)

    kernel = _paste_post_masked_kernel if return_masked else _paste_post_kernel

    if P % 128 == 0:
        rows_total = P // 128
        R, fp = _select_rows(rows_total, C, return_masked, budget, max_px, N)
        # Metadata-only reshapes (last dims stay contiguous): no extra HBM pass.
        img_in = images.reshape(N, C, rows_total, 128)
        msk_in = masks.reshape(N, 1, rows_total, 128)
        grid = (N, rows_total // R)
        blk = lambda b, t: (b, 0, t, 0)
        in_specs = [pl.BlockSpec((1, C, R, 128), blk),
                    pl.BlockSpec((1, 1, R, 128), blk)]
        post_spec = pl.BlockSpec((1, C, R, 128), blk)
        masked_spec = pl.BlockSpec((1, C, R, 128), blk)
        post_sds = jax.ShapeDtypeStruct((N, C, rows_total, 128), jnp.uint8)
        masked_sds = jax.ShapeDtypeStruct((N, C, rows_total, 128), jnp.float32)
        dims = ("parallel", "parallel")
    else:
        # TODO(synk): H*W not a multiple of 128 -> fall back to one full-image
        # spatial block per batch element (block == full array dims is legal);
        # no padding pass, but only N-way grid parallelism on this path.
        Ppad = _round_up(P, 128)
        per = (_round_up(C, 8) * Ppad * 4 + 8 * Ppad * 4
               + _round_up(C, 32) * Ppad)
        if return_masked:
            per += _round_up(C, 8) * Ppad * 4
        fp = 2 * per
        img_in = images.reshape(N, C, P)
        msk_in = masks.reshape(N, 1, P)
        grid = (N,)
        blk = lambda b: (b, 0, 0)
        in_specs = [pl.BlockSpec((1, C, P), blk),
                    pl.BlockSpec((1, 1, P), blk)]
        post_spec = pl.BlockSpec((1, C, P), blk)
        masked_spec = pl.BlockSpec((1, C, P), blk)
        post_sds = jax.ShapeDtypeStruct((N, C, P), jnp.uint8)
        masked_sds = jax.ShapeDtypeStruct((N, C, P), jnp.float32)
        dims = ("parallel",)

    if return_masked:
        out_shape = (post_sds, masked_sds)
        out_specs = [post_spec, masked_spec]
    else:
        out_shape = post_sds
        out_specs = post_spec

    vmem_limit = max(fp + (8 << 20), 32 << 20)
    vmem_limit = min(vmem_limit, max(int(vmem_cap * 0.9), fp + (1 << 20)))

    result = pl.pallas_call(
        kernel,
        out_shape=out_shape,
        grid_spec=pltpu.PrefetchScalarGridSpec(
            num_scalar_prefetch=0,
            grid=grid,
            in_specs=in_specs,
            out_specs=out_specs,
        ),
        compiler_params=pltpu.CompilerParams(
            dimension_semantics=dims,
            vmem_limit_bytes=int(vmem_limit),
        ),
        cost_estimate=cost,
    )(img_in, msk_in)

    if return_masked:
        post, masked = result
        # TODO(synk): Genetator()/Discriminator() are not defined in the
        # reference source, so the generator outputs (outputs, f32, f64, f128)
        # that would consume `masked` cannot be implemented.
        return post.reshape(N, C, H, W), masked.reshape(N, C, H, W)
    return result.reshape(N, C, H, W)


def postprocess_nhwc_host(post_nchw_u8):
    """NCHW->NHWC permute of the postprocess image, done host-side on the
    1-byte tensor (it only feeds imsave, so no extra device HBM pass)."""
    # TODO(synk): imsave(output, 'model.jpg') file I/O side effect is skipped.
    return np.transpose(np.asarray(post_nchw_u8), (0, 2, 3, 1))


if __name__ == "__main__":
    key = jax.random.PRNGKey(0)
    k_img, k_mask = jax.random.split(key)

    N, C, H, W = 2, 3, 16, 16
    images = jax.random.uniform(k_img, (N, C, H, W), dtype=jnp.float32)
    # binary 0/1 mask, broadcast over channels like the PyTorch model
    masks = (jax.random.uniform(k_mask, (N, 1, H, W)) > 0.5).astype(jnp.float32)

    # default (perf) path: postprocess image only
    post = paste_model_forward(images, masks)
    # optional path: also materialize images_masked (the generator's input)
    post2, masked = paste_model_forward(images, masks, return_masked=True)
    jax.block_until_ready((post, post2, masked))

    # sanity check against plain JAX reference
    ref_masked = images * (1.0 - masks) + masks
    ref_post = (ref_masked * 255.0).astype(jnp.uint8)

    assert post.shape == (N, C, H, W) and post.dtype == jnp.uint8
    assert jnp.array_equal(post, ref_post)
    assert jnp.array_equal(post2, ref_post)
    assert jnp.allclose(masked, ref_masked)

    nhwc = postprocess_nhwc_host(post)
    assert nhwc.shape == (N, H, W, C)
    assert np.array_equal(nhwc, np.transpose(np.asarray(ref_post), (0, 2, 3, 1)))

    print("KERNEL_OK")
</pallas_src>

<mosaic_0001>
module attributes {stable_mosaic.version = 11 : i64} {
  func.func @_paste_post_kernel(%arg0: i32, %arg1: i32, %arg2: memref<1x3x2x128xf32, #tpu.memory_space<vmem>>, %arg3: memref<1x1x2x128xf32, #tpu.memory_space<vmem>>, %arg4: memref<1x3x2x128xi8, #tpu.memory_space<vmem>>) attributes {dimension_semantics = [#tpu.dimension_semantics<parallel>, #tpu.dimension_semantics<parallel>], iteration_bounds = array<i64: 2, 1>, scalar_prefetch = 0 : i64, scratch_operands = 0 : i64, tpu.core_type = #tpu.core_type<tc>, window_params = [{transform_indices = @transform_0, window_bounds = array<i64: 1, 3, 2, 128>}, {transform_indices = @transform_1, window_bounds = array<i64: 1, 1, 2, 128>}, {transform_indices = @transform_2, window_bounds = array<i64: 1, 3, 2, 128>}]} {
    %c0 = arith.constant 0 : index
    %c0_0 = arith.constant 0 : index
    %c0_1 = arith.constant 0 : index
    %c0_2 = arith.constant 0 : index
    %0 = vector.load %arg2[%c0, %c0_0, %c0_1, %c0_2] : memref<1x3x2x128xf32, #tpu.memory_space<vmem>>, vector<1x3x2x128xf32>
    %c0_3 = arith.constant 0 : index
    %c0_4 = arith.constant 0 : index
    %c0_5 = arith.constant 0 : index
    %c0_6 = arith.constant 0 : index
    %1 = vector.load %arg3[%c0_3, %c0_4, %c0_5, %c0_6] : memref<1x1x2x128xf32, #tpu.memory_space<vmem>>, vector<1x1x2x128xf32>
    %cst = arith.constant 1.000000e+00 : f32
    %2 = vector.broadcast %cst : f32 to vector<1x1x2x128xf32>
    %3 = arith.subf %2, %1 : vector<1x1x2x128xf32>
    %4 = vector.broadcast %3 : vector<1x1x2x128xf32> to vector<1x3x2x128xf32>
    %5 = arith.mulf %0, %4 : vector<1x3x2x128xf32>
    %6 = vector.broadcast %1 : vector<1x1x2x128xf32> to vector<1x3x2x128xf32>
    %7 = arith.addf %5, %6 : vector<1x3x2x128xf32>
    %cst_7 = arith.constant 2.550000e+02 : f32
    %8 = vector.broadcast %cst_7 : f32 to vector<1x3x2x128xf32>
    %9 = arith.mulf %7, %8 : vector<1x3x2x128xf32>
    %10 = arith.fptoui %9 : vector<1x3x2x128xf32> to vector<1x3x2x128xi8>
    %c0_8 = arith.constant 0 : index
    %c0_9 = arith.constant 0 : index
    %c0_10 = arith.constant 0 : index
    %c0_11 = arith.constant 0 : index
    %11 = vector.load %arg4[%c0_8, %c0_9, %c0_10, %c0_11] : memref<1x3x2x128xi8, #tpu.memory_space<vmem>>, vector<1x3x2x128xi8>
    tpu.vector_store %arg4[%c0_8, %c0_9, %c0_10, %c0_11], %10 {strides = array<i32>} : memref<1x3x2x128xi8, #tpu.memory_space<vmem>>, vector<1x3x2x128xi8>,
    return
  }
  func.func @transform_0(%arg0: i32, %arg1: i32) -> (i32, i32, i32, i32) {
    %c0_i32 = arith.constant 0 : i32
    %c0_i32_0 = arith.constant 0 : i32
    %c0_i32_1 = arith.constant 0 : i32
    return %arg0, %c0_i32, %arg1, %c0_i32_0 : i32, i32, i32, i32
  }
  func.func @transform_1(%arg0: i32, %arg1: i32) -> (i32, i32, i32, i32) {
    %c0_i32 = arith.constant 0 : i32
    %c0_i32_0 = arith.constant 0 : i32
    %c0_i32_1 = arith.constant 0 : i32
    return %arg0, %c0_i32, %arg1, %c0_i32_0 : i32, i32, i32, i32
  }
  func.func @transform_2(%arg0: i32, %arg1: i32) -> (i32, i32, i32, i32) {
    %c0_i32 = arith.constant 0 : i32
    %c0_i32_0 = arith.constant 0 : i32
    %c0_i32_1 = arith.constant 0 : i32
    return %arg0, %c0_i32, %arg1, %c0_i32_0 : i32, i32, i32, i32
  }
}

</mosaic_0001>

<bundles_post_ra>
// kernel: tpu_custom_call.1
= control target key start
LH: loop header
LB: loop body
LE: loop exit
PB: predicated region body
PF: predicated region fallthrough
CT: control target
= control target key end

     0   :  { %7 = vsyncpa [#allocation3], 0  ;;  %s707_s0 = inlined_call_operand.hbm [shape: f32[2,3,2,128], index: 0, kind: input, shape index: {}]   ;;  %s708_s1 = inlined_call_operand.hbm [shape: f32[2,1,2,128], index: 1, kind: input, shape index: {}]   ;;  %s709_s2 = inlined_call_operand.vmem [shape: u8[2,3,2,128], index: 2, kind: output, shape index: {}]  }
   0x1   :  { %9 = vsyncpa [#allocation3 + $0x1], 0 }
   0x2   :  { %10 = vsyncpa [#allocation5], 0 }
   0x3   :  { %12 = vsyncpa [#allocation5 + $0x1], 0  ;;  %s589_s9 = smov 0   ;;  %s591_s10 = smov 0  }
   0x4   :  { %s593_s11 = smov 0   ;;  %s595_s12 = smov 0  }
   0x5   :  { %s597_s13 = smov 0   ;;  %s599_s14 = smov 0  }
   0x6 LB: > { %s375_s15 = sadd.s32 4294967295, %s568_s14   ;;  %s30_s16 = sadd.s32 1, %s564_s13  ;;  %s568_s14 = sphi %s599_s14, %s18_s14   ;;  %s564_s13 = sphi %s597_s13, %s717_s13   ;;  %s560_s12 = sphi %s595_s12, %s716_s12   ;;  %s556_s11 = sphi %s593_s11, %s715_s11   ;;  %s552_s10 = sphi %s591_s10, %s714_s10   ;;  %s548_s9 = sphi %s589_s9, %s713_s9  }
   0x7   : > { %p32_p0 = scmp.ge.s32.totalorder %s30_s16, 2  ;;  %s39_s17 = sadd.s32 1, %s556_s11 }
   0x8   : > { %p46_p1 = scmp.ne.s32.totalorder %s556_s11, %s552_s10  ;;  %p47_p2 = scmp.eq.s32.totalorder %s568_s14, 0 }
   0x9   : > { %s719_s16 = smov (%p32_p0, %s30_s16), 0  ;;  %p52_p4 = scmp.ne.s32.totalorder %s552_s10, %s548_s9 }
   0xa   : > { %p48_p3 = por %p47_p2, %p46_p1  ;;  %s34_s18 = ssub.s32 %s564_s13, %s719_s16 }
   0xb   : > { %p53_p5 = scmp.eq.s32.totalorder %s375_s15, 0  ;;  %p37_p6 = scmp.eq.s32.totalorder %s34_s18, 0 }
   0xc   : > { %p407_p8 = scmp.lt.s32.totalorder %s568_s14, 2  ;;  %s637_s21 = sand.u32 1, %s556_s11  }
   0xd   : > { %p628_p7 = por %p53_p5, %p52_p4  ;;  %s387_s22 = smul.u32 96, %s564_s13 }
   0xe   : > { %s634_s20 = scalar_select %p37_p6, %s556_s11, %s39_s17  }
   0xf   : > { %s386_s23 = smul.u32 6, %s637_s21  ;;  %s143_s26 = scalar_lea.hbm %s707_s0, %s387_s22 }
  0x10   : > { %p644_p9 = pnand %p407_p8, %p48_p3  ;;  %s133_s30 = scalar_lea.sflag [#allocation3], %s637_s21 }
  0x11   : > { %s136_s28 = scalar_lea.vmem [#allocation2], %s386_s23  ;;  %s570_s4 = smov [#allocation2]  }
  0x12   : > { %s144_s29 = sshll.u32 %s136_s28, 4  ;;  %p460_p10 = pneg %p644_p9  ;;  %s145_s29 = int_to_ptr.vmem [resolvable:$true] %s144_s29 }
  0x13   : > { %s471_s3 = scalar_lea.vmem %s145_s29, 96  ;;  %s476_s5 = sshll.u32 %s570_s4, 4  ;;  %s477_s5 = int_to_ptr.vmem [resolvable:$false] %s476_s5 }
  0x14   : > { %p472_p11 = scmp.ne.s32.totalorder %s145_s29, %s471_s3  ;;  %s478_s6 = scalar_lea.vmem %s477_s5, 192 }
  0x15   : > { %p479_p0 = scmp.lt.s32.totalorder %s145_s29, %s477_s5  ;;  %p480_p1 = scmp.lt.s32.totalorder %s478_s6, %s471_s3 }
  0x16   : > { %p474_p12 = pnand %p472_p11, %p460_p10 }
  0x17   : > { %p481_p2 = por %p480_p1, %p479_p0 }
  0x18   : > { %p475_p13 = pneg %p474_p12 }
  0x1a   : > { %p482_p3 = pnand %p481_p2, %p475_p13 }
  0x1c   : > { %485 = shalt.err (!%p482_p3)
}
  0x1d   : > { %s571_s7 = smov 32   ;;  %s572_s8 = smov 2  }
  0x1e   : > { %403 = dma.hbm_to_vmem [thread:$0]  (!%p644_p9), %s143_s26, 96, %s145_s29, %s133_s30, %s571_s7, %s571_s7, %s572_s8  }
  0x1f   : > { %p382_p4 = scmp.ge.s32.totalorder %s568_s14, 1  ;;  %p171_p5 = scmp.lt.s32.totalorder %s568_s14, 3 }
  0x20   : > { %s380_s9 = sshll.u32 %s637_s21, 1  ;;  %s381_s17 = sshll.u32 %s564_s13, 5 }
  0x21   : > { %p659_p6 = pnand %p382_p4, %p171_p5  ;;  %s158_s18 = scalar_lea.vmem [#allocation4], %s380_s9 }
  0x22   : > { %s166_s22 = sshll.u32 %s158_s18, 4  ;;  %s164_s25 = scalar_lea.hbm %s708_s1, %s381_s17  ;;  %s167_s22 = int_to_ptr.vmem [resolvable:$true] %s166_s22 }
  0x23   : > { %s155_s28 = scalar_lea.sflag [#allocation5], %s637_s21  ;;  %s499_s3 = scalar_lea.vmem %s167_s22, 32 }
  0x24   : > { %p500_p8 = scmp.ne.s32.totalorder %s167_s22, %s499_s3  ;;  %s573_s26 = smov [#allocation4]  }
  0x25   : > { %s504_s29 = sshll.u32 %s573_s26, 4  ;;  %s505_s29 = int_to_ptr.vmem [resolvable:$false] %s504_s29 }
  0x26   : > { %p502_p11 = pnand %p500_p8, %p460_p10  ;;  %s506_s30 = scalar_lea.vmem %s505_s29, 64 }
  0x27   : > { %p507_p13 = scmp.lt.s32.totalorder %s167_s22, %s505_s29  ;;  %p508_p0 = scmp.lt.s32.totalorder %s506_s30, %s499_s3 }
  0x28   : > { %p503_p12 = pneg %p502_p11 }
  0x29   : > { %p509_p1 = por %p508_p0, %p507_p13 }
  0x2b   : > { %p510_p2 = pnand %p509_p1, %p503_p12 }
  0x2d   : > { %513 = shalt.err (!%p510_p2)
}
  0x2e   : > { %406 = dma.hbm_to_vmem [thread:$0]  (!%p644_p9), %s164_s25, 32, %s167_s22, %s155_s28  }
  0x2f   : > { %175 = sbr.rel (%p659_p6) target bundleno = 80 (0x50), region = 28  ;;  %s177_s21 = sand.u32 (!%p659_p6), 1, %s552_s10  }
  0x30   : > { %s388_s4 = smul.u32 (!%p659_p6), 6, %s177_s21  ;;  %s178_s5 = scalar_lea.sflag (!%p659_p6), [#allocation3], %s177_s21 }
  0x32   : > { %s181_s6 = scalar_lea.vmem (!%p659_p6), [#allocation2], %s388_s4 }
  0x34   : > { %539 = dma.done.wait (%p628_p7), %s178_s5, 96  }
  0x35   : > { %541 = vsyncadd (%p628_p7), %s178_s5, 4294967200  ;;  %s383_s7 = sshll.u32 %s177_s21, 1  ;;  %s187_s8 = scalar_lea.sflag [#allocation5], %s177_s21 }
  0x36   : > { %s190_s9 = scalar_lea.vmem [#allocation4], %s383_s7 }
  0x37   : > { %543 = dma.done.wait (%p628_p7), %s187_s8, 32  }
  0x38   : > { %545 = vsyncadd (%p628_p7), %s187_s8, 4294967264  ;;  %v225_v0 = vld [vmem:[%s181_s6] sm:$0x3]  ;;  %v228_v1 = vld [vmem:[%s190_s9] sm:$0x3]  ;;  %p218_p9 = scmp.lt.s32.totalorder %s560_s12, 1 }
  0x39   : > { %v229_v2 = vsub.f32 1.0, %v228_v1  ;;  %v226_v3 = vld [vmem:[%s181_s6 + $0x2] sm:$0x3]  ;;  %v227_v4 = vld [vmem:[%s181_s6 + $0x4] sm:$0x3]  ;;  %vm254_vm0 = vcmask 1040384  }
  0x3a   : > { %s721_s12 = smov (!%p218_p9, %s560_s12), 1  ;;  %vm255_vm1 = vsmask.f32 256 }
  0x3b   : > { %v230_v5 = vmul.f32 %v229_v2, %v225_v0  ;;  %v231_v6 = vmul.f32 %v229_v2, %v226_v3  ;;  %v232_v7 = vmul.f32 %v229_v2, %v227_v4  ;;  %s389_s19 = smul.u32 3, %s721_s12  ;;  %vm256_vm2 = vmand %vm254_vm0, %vm255_vm1 }
  0x3d   : > { %v233_v8 = vadd.f32 %v230_v5, %v228_v1  ;;  %v234_v9 = vadd.f32 %v231_v6, %v228_v1  ;;  %v235_v10 = vadd.f32 %v232_v7, %v228_v1  ;;  %s224_s17 = scalar_lea.vmem %s709_s2, %s389_s19 }
  0x3e   : > { %v257_v29 = vld [vmem:[%s224_s17] sm:$0x1]  ;;  %v260_v30 = vld [vmem:[%s224_s17 + $0x1] sm:$0x1]  ;;  %v263_v31 = vld [vmem:[%s224_s17 + $0x2] sm:$0x1] }
  0x3f   : > { %v236_v11 = vmul.f32 255.0, %v233_v8  ;;  %v237_v12 = vmul.f32 255.0, %v234_v9  ;;  %v238_v13 = vmul.f32 255.0, %v235_v10 }
  0x41   : > { %v239_v14 = vmax.f32 %v236_v11, 0.0  ;;  %v240_v15 = vmax.f32 %v237_v12, 0.0  ;;  %v241_v16 = vmax.f32 %v238_v13, 0.0 }
  0x43   : > { %v242_v17 = vmin.f32 %v239_v14, 255.0  ;;  %v243_v18 = vmin.f32 %v240_v15, 255.0  ;;  %v244_v19 = vmin.f32 %v241_v16, 255.0 }
  0x45   : > { %v390_v20 = vtrunc.f32 %v242_v17  ;;  %v392_v21 = vtrunc.f32 %v243_v18  ;;  %v394_v22 = vtrunc.f32 %v244_v19 }
  0x47   : > { %v391_v23 = vcvt.f32.s32 %v390_v20  ;;  %v393_v24 = vcvt.f32.s32 %v392_v21  ;;  %v395_v25 = vcvt.f32.s32 %v394_v22 }
  0x49   : > { %v248_v26 = vpack.c.b16 %v391_v23, %v391_v23  ;;  %v250_v27 = vpack.c.b16 %v393_v24, %v393_v24  ;;  %v252_v28 = vpack.c.b16 %v395_v25, %v395_v25 }
  0x4b   : > { %v249_v32 = vpack.c.b8 %v248_v26, %v248_v26  ;;  %v251_v33 = vpack.c.b8 %v250_v27, %v250_v27  ;;  %v253_v34 = vpack.c.b8 %v252_v28, %v252_v28 }
  0x4d   : > { %v258_v35 = vsel %vm256_vm2, %v249_v32, %v257_v29  ;;  %v261_v36 = vsel %vm256_vm2, %v251_v33, %v260_v30  ;;  %v264_v37 = vsel %vm256_vm2, %v253_v34, %v263_v31 }
  0x4e   : > { %259 = vst [vmem:[%s224_s17] sm:$0x1] %v258_v35  ;;  %262 = vst [vmem:[%s224_s17 + $0x1] sm:$0x1] %v261_v36 }
  0x4f   : > { %265 = vst [vmem:[%s224_s17 + $0x2] sm:$0x1] %v264_v37 }
  0x50 PF: > { %s18_s14 = sadd.s32 1, %s568_s14   ;;  %s713_s9 = smov %s552_s10 }
  0x51   : > { %p15_p7 = scmp.ge.s32.totalorder %s18_s14, 4   ;;  %s714_s10 = smov %s556_s11 }
  0x52   : > { %s715_s11 = smov %s634_s20  ;;  %s716_s12 = smov %s564_s13 }
  0x53   : > { %s717_s13 = smov %s719_s16  ;;  %17 = sbr.rel (!%p15_p7) target bundleno = 6 (0x6), region = 81 }
  0x58   :  { %291 = vsyncpa [#allocation3], 1 }
  0x59   :  { %293 = vsyncpa [#allocation3 + $0x1], 1 }
  0x5a   :  { %294 = vsyncpa [#allocation5], 1 }
  0x5b   :  { %296 = vsyncpa [#allocation5 + $0x1], 1 }

</bundles_post_ra>
